<compile_context>
chip_gen: v6e
topology: v6e:2x2x1
jax: 0.10.0
libtpu: 0.0.40
codegen_flags: <defaults>
</compile_context>

<pallas_src>
import functools
import math

import jax
import jax.numpy as jnp
from jax.experimental import pallas as pl
from jax.experimental.pallas import tpu as pltpu

_TWO_PI = 2.0 * math.pi


def _gfp_kernel(x_ref, w_ref, o_ref, *, half: int):
    # x_ref: (TB, 1) f32   — one scalar per row
    # w_ref: (1, half) f32 — fixed Gaussian frequencies (VMEM-resident)
    # o_ref: (TB, 2*half)  — [sin | cos] per row
    x = x_ref[...]                       # (TB, 1)
    w = w_ref[...]                       # (1, half)
    proj = (x * _TWO_PI) * w             # (TB, half) outer product on the VPU
    o_ref[:, :half] = jnp.sin(proj).astype(o_ref.dtype)
    o_ref[:, half:] = jnp.cos(proj).astype(o_ref.dtype)


def gaussian_fourier_projection(x: jax.Array, W: jax.Array) -> jax.Array:
    """x: (..., 1) time steps; W: (embed_dim//2,) fixed Gaussian weights.

    Returns concat([sin(x*W*2pi), cos(x*W*2pi)], axis=-1) of shape (..., embed_dim).
    """
    orig_dtype = x.dtype
    if x.ndim >= 1 and x.shape[-1] == 1:
        lead_shape = x.shape[:-1]
    else:
        lead_shape = x.shape  # treat every element as an independent scalar

    x2 = x.reshape(-1, 1).astype(jnp.float32)          # (B, 1)
    B = x2.shape[0]
    half = W.shape[0]
    embed = 2 * half
    w2 = W.reshape(1, half).astype(jnp.float32)        # (1, half)

    # Tile the batch axis: whole array for small B, 1024-row tiles otherwise
    # (multiple of 8 -> valid sublane tiling; keeps VMEM footprint bounded on v7x).
    TB = B if B <= 1024 else 1024
    grid = (pl.cdiv(B, TB),)

    kernel = functools.partial(_gfp_kernel, half=half)

    out = pl.pallas_call(
        kernel,
        out_shape=jax.ShapeDtypeStruct((B, embed), jnp.float32),
        grid_spec=pltpu.PrefetchScalarGridSpec(
            num_scalar_prefetch=0,
            grid=grid,
            in_specs=[
                pl.BlockSpec((TB, 1), lambda i: (i, 0)),      # batch tile of scalars
                pl.BlockSpec((1, half), lambda i: (0, 0)),    # W: constant block -> VMEM-resident
            ],
            out_specs=pl.BlockSpec((TB, embed), lambda i: (i, 0)),
        ),
        compiler_params=pltpu.CompilerParams(
            dimension_semantics=("parallel",),
        ),
    )(x2, w2)

    return out.reshape(*lead_shape, embed).astype(orig_dtype)


def gaussian_fourier_projection_ref(x: jax.Array, W: jax.Array) -> jax.Array:
    """Pure-JAX reference mirroring the PyTorch module."""
    x_proj = x.astype(jnp.float32) * W.astype(jnp.float32) * 2.0 * math.pi
    out = jnp.concatenate([jnp.sin(x_proj), jnp.cos(x_proj)], axis=-1)
    return out.astype(x.dtype)


if __name__ == "__main__":
    embed_dim = 32
    scale = 30.0
    B = 8

    key = jax.random.PRNGKey(0)
    k_w, k_x = jax.random.split(key)
    # Fixed (non-trainable) Gaussian weights, exactly as in the module's __init__.
    W = jax.random.normal(k_w, (embed_dim // 2,), dtype=jnp.float32) * scale
    # Time steps in [0, 1), shape (B, 1) so x * W broadcasts like the PyTorch forward.
    x = jax.random.uniform(k_x, (B, 1), dtype=jnp.float32)

    out = gaussian_fourier_projection(x, W)
    out = jax.block_until_ready(out)

    ref = gaussian_fourier_projection_ref(x, W)
    assert out.shape == (B, embed_dim), out.shape
    assert out.dtype == jnp.float32
    max_err = float(jnp.max(jnp.abs(out - ref)))
    assert jnp.allclose(out, ref, atol=1e-3, rtol=1e-3), max_err

    print("KERNEL_OK")
</pallas_src>

<mosaic_0001>
module attributes {stable_mosaic.version = 11 : i64} {
  func.func @_gfp_kernel(%arg0: i32, %arg1: memref<8x1xf32, #tpu.memory_space<vmem>>, %arg2: memref<1x16xf32, #tpu.memory_space<vmem>>, %arg3: memref<8x32xf32, #tpu.memory_space<vmem>>) attributes {dimension_semantics = [#tpu.dimension_semantics<parallel>], iteration_bounds = array<i64: 1>, scalar_prefetch = 0 : i64, scratch_operands = 0 : i64, tpu.core_type = #tpu.core_type<tc>, window_params = [{transform_indices = @transform_0, window_bounds = array<i64: 8, 1>}, {pipeline_mode = #tpu.pipeline_mode<synchronous>, transform_indices = @transform_1, window_bounds = array<i64: 1, 16>}, {transform_indices = @transform_2, window_bounds = array<i64: 8, 32>}]} {
    %c0 = arith.constant 0 : index
    %c0_0 = arith.constant 0 : index
    %0 = vector.load %arg1[%c0, %c0_0] : memref<8x1xf32, #tpu.memory_space<vmem>>, vector<8x1xf32>
    %c0_1 = arith.constant 0 : index
    %c0_2 = arith.constant 0 : index
    %1 = vector.load %arg2[%c0_1, %c0_2] : memref<1x16xf32, #tpu.memory_space<vmem>>, vector<1x16xf32>
    %cst = arith.constant 6.28318548 : f32
    %2 = vector.broadcast %cst : f32 to vector<8x1xf32>
    %3 = arith.mulf %0, %2 : vector<8x1xf32>
    %4 = vector.broadcast %3 : vector<8x1xf32> to vector<8x16xf32>
    %5 = vector.broadcast %1 : vector<1x16xf32> to vector<8x16xf32>
    %6 = arith.mulf %4, %5 : vector<8x16xf32>
    %7 = math.sin %6 : vector<8x16xf32>
    %c0_3 = arith.constant 0 : index
    %c0_4 = arith.constant 0 : index
    %8 = vector.load %arg3[%c0_3, %c0_4] : memref<8x32xf32, #tpu.memory_space<vmem>>, vector<8x16xf32>
    tpu.vector_store %arg3[%c0_3, %c0_4], %7 {strides = array<i32>} : memref<8x32xf32, #tpu.memory_space<vmem>>, vector<8x16xf32>,
    %9 = math.cos %6 : vector<8x16xf32>
    %c0_5 = arith.constant 0 : index
    %c16 = arith.constant 16 : index
    %10 = vector.load %arg3[%c0_5, %c16] : memref<8x32xf32, #tpu.memory_space<vmem>>, vector<8x16xf32>
    tpu.vector_store %arg3[%c0_5, %c16], %9 {strides = array<i32>} : memref<8x32xf32, #tpu.memory_space<vmem>>, vector<8x16xf32>,
    return
  }
  func.func @transform_0(%arg0: i32) -> (i32, i32) {
    %c0_i32 = arith.constant 0 : i32
    %c0_i32_0 = arith.constant 0 : i32
    return %arg0, %c0_i32 : i32, i32
  }
  func.func @transform_1(%arg0: i32) -> (i32, i32) {
    %c0_i32 = arith.constant 0 : i32
    %c0_i32_0 = arith.constant 0 : i32
    %c0_i32_1 = arith.constant 0 : i32
    return %c0_i32, %c0_i32_0 : i32, i32
  }
  func.func @transform_2(%arg0: i32) -> (i32, i32) {
    %c0_i32 = arith.constant 0 : i32
    %c0_i32_0 = arith.constant 0 : i32
    return %arg0, %c0_i32 : i32, i32
  }
}

</mosaic_0001>

<bundles_post_ra>
// kernel: tpu_custom_call.1
= control target key start
LH: loop header
LB: loop body
LE: loop exit
PB: predicated region body
PF: predicated region fallthrough
CT: control target
= control target key end

     0   :  { %v305_v1 = vmov 0   ;;  %s360_s0 = inlined_call_operand.vmem [shape: f32[8,1], index: 0, kind: input, shape index: {}]   ;;  %s361_s1 = inlined_call_operand.vmem [shape: f32[1,16], index: 1, kind: input, shape index: {}]   ;;  %s362_s2 = inlined_call_operand.hbm [shape: f32[8,32], index: 2, kind: output, shape index: {}]  }
   0x1   :  { %v12_v0 = vld [vmem:[%s360_s0] sm:$0xff]  ;;  %278 = vset.pattern.permute.xlu0 %v305_v1 }
   0x2   :  { %v14_v2 = vmul.f32 6.2831855, %v12_v0 }
   0x4   :  { %17 = vperm.xlu0 %278, %v14_v2  }
   0x5   :  { %7 = vsyncpa [#allocation3], 0  ;;  %v256_v3 = vld [vmem:[%s361_s1] ss:$0 sm:$0xff]  ;;  %v306_v16 = vmov 683565275  }
   0x6   :  { %v307_v18 = vmov 2475754826   ;;  %v308_v21 = vmov 2131351028   ;;  %v309_v24 = vmov 2102212464  }
   0x7   :  { %v310_v27 = vmov 920167782   ;;  %v311_v30 = vmov 1326507024   ;;  %vm131_vm11 = vcmask 130048   ;;  %s312_s0 = smov 16  }
   0x8   :  { %s313_s1 = smov [#allocation2]  }
   0x9   :  { %s248_s13 = sshll.u32 %s313_s1, 4  ;;  %s249_s13 = int_to_ptr.vmem [resolvable:$true] %s248_s13 }
   0xa   :  { %s283_s14 = scalar_lea.vmem %s249_s13, 128  ;;  %p288_p1 = scmp.lt.s32.totalorder %s249_s13, %s249_s13 }
   0xb   :  { %p284_p0 = scmp.ne.s32.totalorder %s249_s13, %s283_s14  ;;  %p289_p2 = scmp.lt.s32.totalorder %s283_s14, %s283_s14 }
   0xd   :  { %p290_p3 = por %p289_p2, %p288_p1 }
   0xf   :  { %p291_p4 = pnand %p290_p3, %p284_p0 }
  0x7f   :  { %v18_v4 = vpop.permute.xlu0 %17 }
  0x80   :  { %v335_v5 = vmul.f32 %v256_v3, %v18_v4 }
  0x82   :  { %v30_v6 = vand.u32 2139095040, %v335_v5  ;;  %v27_v10 = vand.u32 2147483647, %v335_v5  ;;  %vm29_vm7 = vcmp.lt.s32.totalorder %v335_v5, 0 }
  0x84   :  { %v31_v7 = vshrl.u32 %v30_v6, 23  ;;  %v34_v13 = vand.u32 8388607, %v27_v10  ;;  %vm28_vm8 = vcmp.le.f32.partialorder %v27_v10, 0.7853982 }
  0x86   :  { %v257_v8 = vadd.s32 4294967169, %v31_v7  ;;  %v35_v32 = vor.u32 8388608, %v34_v13 }
  0x88   :  { %v37_v9 = vadd.s32 1, %v257_v8  ;;  %v75_v46 = vshll.u32 %v35_v32, 8 }
  0x8a   :  { %vm38_vm0 = vcmp.gt.s32.totalorder %v37_v9, 0 }
  0x8b   :  { %v39_v11 = vsel %vm38_vm0, %v37_v9, 0  ;;  %vm119_vm0 = vweird.f32 %v335_v5 }
  0x8c   :  { %v41_v12 = vand.u32 31, %v39_v11  ;;  %v40_v15 = vshrl.u32 %v39_v11, 5 }
  0x8e   :  { %v42_v14 = vsub.s32 32, %v41_v12  ;;  %v44_v17 = vshll.u32 %v306_v16, %v41_v12  ;;  %v47_v19 = vshll.u32 %v307_v18, %v41_v12  ;;  %v50_v23 = vshll.u32 %v308_v21, %v41_v12 }
  0x8f   :  { %v53_v26 = vshll.u32 %v309_v24, %v41_v12  ;;  %v56_v29 = vshll.u32 %v310_v27, %v41_v12  ;;  %vm59_vm1 = vcmp.lt.s32.totalorder %v40_v15, 1  ;;  %vm62_vm2 = vcmp.lt.s32.totalorder %v40_v15, 4 }
  0x90   :  { %v45_v20 = vshrl.u32 %v307_v18, %v42_v14  ;;  %v48_v22 = vshrl.u32 %v308_v21, %v42_v14  ;;  %v51_v25 = vshrl.u32 %v309_v24, %v42_v14  ;;  %v54_v28 = vshrl.u32 %v310_v27, %v42_v14 }
  0x91   :  { %v57_v31 = vshrl.u32 %v311_v30, %v42_v14  ;;  %v43_v41 = vshrl.u32 %v306_v16, %v42_v14  ;;  %vm61_vm3 = vcmp.lt.s32.totalorder %v40_v15, 3  ;;  %vm60_vm4 = vcmp.lt.s32.totalorder %v40_v15, 2 }
  0x92   :  { %v46_v33 = vor.u32 %v45_v20, %v44_v17  ;;  %v49_v34 = vor.u32 %v48_v22, %v47_v19  ;;  %v52_v35 = vor.u32 %v51_v25, %v50_v23  ;;  %v55_v36 = vor.u32 %v54_v28, %v53_v26 }
  0x93   :  { %v58_v37 = vor.u32 %v57_v31, %v56_v29 }
  0x94   :  { %v64_v38 = vsel %vm62_vm2, %v52_v35, 2102212464  ;;  %v67_v39 = vsel %vm59_vm1, %v46_v33, %v49_v34  ;;  %v71_v40 = vsel %vm59_vm1, %v49_v34, %v52_v35  ;;  %v68_v42 = vsel %vm62_vm2, %v55_v36, 920167782 }
  0x95   :  { %v72_v43 = vsel %vm62_vm2, %v58_v37, 1326507024  ;;  %v69_v44 = vsel %vm61_vm3, %v52_v35, %v68_v42  ;;  %v63_v47 = vsel %vm59_vm1, %v43_v41, %v46_v33  ;;  %v65_v48 = vsel %vm61_vm3, %v49_v34, %v64_v38 }
  0x96   :  { %v73_v45 = vsel %vm61_vm3, %v55_v36, %v72_v43  ;;  %v70_v49 = vsel %vm60_vm4, %v67_v39, %v69_v44  ;;  %v66_v55 = vsel %vm60_vm4, %v63_v47, %v65_v48  ;;  %vm240_vm1 = vcmask 261248  }
  0x97   :  { %v74_v50 = vsel %vm60_vm4, %v71_v40, %v73_v45  ;;  %v344_v53 = vmul.u32.u64.low %v75_v46, %v70_v49  ;;  %v345_v54 = vmul.u32.u64.high %v75_v46, %v70_v49, %v344_v53  ;;  %v82_v57 = vmul.u32 %v75_v46, %v66_v55 }
  0x98   :  { %v341_v51 = vmul.u32.u64.low %v75_v46, %v74_v50  ;;  %v342_v52 = vmul.u32.u64.high %v75_v46, %v74_v50, %v341_v51 }
  0x99   :  { %v85_v56 = vadd.s32 1, %v345_v54 }
  0x9a   :  { %vm84_vm5 = vc.u32 %v342_v52, %v344_v53  ;;  %v83_v6 = vadd.s32 %v344_v53, %v342_v52 }
  0x9b   :  { %v86_v58 = vsel %vm84_vm5, %v85_v56, %v345_v54 }
  0x9c   :  { %v87_v59 = vadd.s32 %v86_v58, %v82_v57 }
  0x9e   :  { %v88_v60 = vadd.s32 536870912, %v87_v59 }
  0xa0   :  { %v89_v61 = vshrl.u32 %v88_v60, 30 }
  0xa2   :  { %v90_v62 = vshll.u32 %v89_v61, 30  ;;  %v113_v20 = vsub.s32 4, %v89_v61 }
  0xa4   :  { %v91_v63 = vsub.s32 %v87_v59, %v90_v62  ;;  %v114_v23 = vsel %vm29_vm7, %v113_v20, %v89_v61 }
  0xa5   :  { %v116_v24 = vsel %vm28_vm8, 0, %v114_v23 }
  0xa6   :  { %v93_v0 = vsub.s32 0, %v91_v63  ;;  %v120_v25 = vadd.s32 3, %v116_v24  ;;  %v226_v27 = vand.u32 3, %v116_v24 }
  0xa8   :  { %v258_v1 = vmin.u32 %v93_v0, %v91_v63  ;;  %v121_v26 = vand.u32 3, %v120_v25  ;;  %vm231_vm10 = vcmp.eq.s32.totalorder %v226_v27, 2  ;;  %vm228_vm13 = vcmp.eq.s32.totalorder %v226_v27, 0 }
  0xa9   :  { %vm227_vm15 = vcmp.lt.s32.totalorder %v226_v27, 2 }
  0xaa   :  { %v95_v2 = vclz %v258_v1  ;;  %vm126_vm9 = vcmp.eq.s32.totalorder %v121_v26, 2  ;;  %vm123_vm12 = vcmp.eq.s32.totalorder %v121_v26, 0  ;;  %vm122_vm14 = vcmp.lt.s32.totalorder %v121_v26, 2 }
  0xac   :  { %v259_v3 = vadd.s32 4294967294, %v95_v2 }
  0xae   :  { %vm260_vm6 = vcmp.lt.s32.totalorder %v259_v3, 0 }
  0xaf   :  { %v98_v4 = vsel %vm260_vm6, 0, %v259_v3 }
  0xb0   :  { %v99_v7 = vsub.s32 32, %v98_v4  ;;  %v103_v8 = vsub.s32 4294967266, %v98_v4  ;;  %v100_v9 = vshll.u32 %v91_v63, %v98_v4 }
  0xb2   :  { %v101_v11 = vshrl.u32 %v83_v6, %v99_v7  ;;  %v104_v12 = vadd.s32 127, %v103_v8 }
  0xb4   :  { %v102_v13 = vor.u32 %v101_v11, %v100_v9  ;;  %v105_v14 = vshll.u32 %v104_v12, 23 }
  0xb6   :  { %v106_v15 = vor.u32 4788187, %v105_v14  ;;  %v109_v17 = vcvt.s32.f32 %v102_v13 }
  0xb8   :  { %v107_v16 = vand.u32 2147483647, %v106_v15 }
  0xba   :  { %v110_v18 = vmul.f32 %v109_v17, %v107_v16 }
  0xbc   :  { %v111_v19 = vxor.u32 2147483648, %v110_v18 }
  0xbe   :  { %v112_v21 = vsel %vm29_vm7, %v111_v19, %v110_v18 }
  0xbf   :  { %v115_v22 = vsel %vm28_vm8, %v335_v5, %v112_v21 }
  0xc0   :  { %279 = vcosq.f32 %v115_v22 }
  0xc1   :  { %281 = vsinq.f32 %v115_v22 }
  0xcd   :  { %v280_v28 = vpop.eup %279 }
  0xce   :  { %v282_v29 = vpop.eup %281  ;;  %v127_v30 = vxor.u32 2147483648, %v280_v28 }
  0xcf   :  { %v124_v31 = vxor.u32 2147483648, %v282_v29 }
  0xd0   :  { %v233_v32 = vsel %vm231_vm10, %v127_v30, %v282_v29  ;;  %v128_v10 = vsel %vm126_vm9, %v127_v30, %v282_v29 }
  0xd1   :  { %v230_v33 = vsel %vm228_vm13, %v280_v28, %v124_v31  ;;  %v125_v34 = vsel %vm123_vm12, %v280_v28, %v124_v31 }
  0xd2   :  { %v234_v35 = vsel %vm227_vm15, %v230_v33, %v233_v32  ;;  %v129_v36 = vsel %vm122_vm14, %v125_v34, %v128_v10 }
  0xd3   :  { %v235_v37 = vsel %vm119_vm0, nan, %v234_v35  ;;  %v130_v38 = vsel %vm119_vm0, nan, %v129_v36 }
  0xd4   :  { %237 = vrot.lane.b32.xlu0 %v235_v37, %s312_s0  ;;  %132 = vst.msk [vmem:[#allocation2] sm:$0xff] %vm131_vm11, %v130_v38 }
 0x146   :  { %v238_v39 = vpop.permute.xlu0 %237 }
 0x147   :  { %241 = vst.msk [vmem:[#allocation2] sm:$0xff] %vm240_vm1, %v238_v39 }
 0x148   :  { %294 = shalt.err (!%p291_p4)
}
 0x149   :  { %251 = dma.vmem_to_hbm [thread:$0]  %s249_s13, 128, %s362_s2, [#allocation3]  }
 0x14a   :  { %303 = dma.done.wait [#allocation3], 128  }
 0x14b   :  { %304 = vsyncadd [#allocation3], 4294967168 }
 0x14c   :  { %255 = vsyncpa [#allocation3], 1 }

</bundles_post_ra>
